<compile_context>
chip_gen: v5e
topology: v5e:2x2
jax: 0.10.0
libtpu: 0.0.40
codegen_flags: <defaults>
</compile_context>

<pallas_src>
import functools

import jax
import jax.numpy as jnp
from jax.experimental import pallas as pl
from jax.experimental.pallas import tpu as pltpu


def anfis_kernel(xT_ref, fz_ref, cT_ref, nis_ref, out_ref):
    """One batch tile, batch on the lane axis.

    xT_ref : (I, TB)  inputs, transposed
    fz_ref : (R, I)   fuzzifier centers (resident)
    cT_ref : (O, R)   consequent, transposed (resident)
    nis_ref: (R, 1)   -1/sigma^2, already broadcast per rule (resident)
    out_ref: (O, TB)  output, transposed (lane-dense store)
    """
    xT = xT_ref[...]                     # (I, TB) f32
    fz = fz_ref[...]                     # (R, I)  f32
    cT = cT_ref[...]                     # (O, R)  f32
    neg_inv_sig_sq = nis_ref[...]        # (R, 1)  f32

    num_inputs = xT.shape[0]
    num_rules = fz.shape[0]
    num_outputs = cT.shape[0]
    tb = xT.shape[1]

    # Squared distance on the VPU: static unroll over the (tiny) input dim.
    # Exact (x - f)^2 formulation -> no cancellation hazard, no MXU round-trip.
    sq_dist = jnp.zeros((num_rules, tb), jnp.float32)
    for i in range(num_inputs):          # static unroll (I is small)
        diff = xT[i:i + 1, :] - fz[:, i:i + 1]            # (R, TB)
        sq_dist = sq_dist + diff * diff

    fuzzy = jnp.exp(sq_dist * neg_inv_sig_sq)             # (R, TB), EUP exp
    denom = jnp.sum(fuzzy, axis=0, keepdims=True)         # (1, TB), sublane reduce

    # Consequent projection as a static unroll over rules: 8 broadcast-FMAs on
    # lane-dense rows; avoids a degenerate (K=8, N=8) MXU op entirely.
    acc = jnp.zeros((num_outputs, tb), jnp.float32)
    for r in range(num_rules):           # static unroll (R is small)
        acc = acc + cT[:, r:r + 1] * fuzzy[r:r + 1, :]    # (O,1)*(1,TB) -> (O,TB)

    # Normalization deferred past the projection; EXACT reciprocal (the approx
    # EUP reciprocal caused the earlier numeric mismatch).
    out_ref[...] = acc * pl.reciprocal(denom, approx=False)


@functools.partial(jax.jit, static_argnames=("tile_b",))
def anfis_forward(x, fuzzifier, consequent, sigma, tile_b=None):
    B, I = x.shape
    R, I2 = fuzzifier.shape
    R2, O = consequent.shape
    assert I2 == I and R2 == R
    # PyTorch broadcast (B, R) / sigma**2 with sigma of shape (O,) needs O == R or O == 1.
    assert O == R or O == 1, "sigma broadcast requires num_outputs == num_rules (or 1)"

    x = x.astype(jnp.float32)
    fuzzifier = fuzzifier.astype(jnp.float32)
    consequent = consequent.astype(jnp.float32)
    sigma = sigma.astype(jnp.float32)

    if tile_b is None:
        # Batch lives on the lane axis -> tile_b must be a multiple of 128.
        # Aim for ~4 grid steps (>= 2 per v7x TensorCore) while keeping tiles
        # large: per-step overhead (~0.35us) dominates small lane-dense tiles.
        b_lane_tiles = pl.cdiv(B, 128)
        tiles_per_step = max(1, pl.cdiv(b_lane_tiles, 4))
        tile_b = min(4096, tiles_per_step * 128)
    assert tile_b % 128 == 0

    n_tiles = pl.cdiv(B, tile_b)
    Bp = n_tiles * tile_b

    # Loop-invariant prep hoisted out of the kernel (pure layout plumbing; XLA fuses).
    xT = x.T                                               # (I, B) -> batch on lanes
    if Bp != B:
        xT = jnp.pad(xT, ((0, 0), (0, Bp - B)))            # pad columns, sliced off later
    cT = consequent.T                                      # (O, R)
    neg_inv_sig_sq = -1.0 / (sigma * sigma)                # (O,)  negation folded in
    neg_inv_col = jnp.broadcast_to(neg_inv_sig_sq, (R,)).reshape(R, 1)   # per-rule (R, 1)

    cost = pl.CostEstimate(
        flops=2 * Bp * R * (I + O) + 2 * Bp * R,
        transcendentals=Bp * R,
        bytes_accessed=4 * Bp * (I + O),
    )

    outT = pl.pallas_call(
        anfis_kernel,
        out_shape=jax.ShapeDtypeStruct((O, Bp), jnp.float32),
        grid_spec=pltpu.PrefetchScalarGridSpec(
            num_scalar_prefetch=0,
            grid=(n_tiles,),
            in_specs=[
                pl.BlockSpec((I, tile_b), lambda i: (0, i)),   # x^T: tiled over batch (lanes)
                pl.BlockSpec((R, I), lambda i: (0, 0)),        # fuzzifier:     resident
                pl.BlockSpec((O, R), lambda i: (0, 0)),        # consequent^T:  resident
                pl.BlockSpec((R, 1), lambda i: (0, 0)),        # -1/sigma^2:    resident
            ],
            out_specs=pl.BlockSpec((O, tile_b), lambda i: (0, i)),
        ),
        compiler_params=pltpu.CompilerParams(
            dimension_semantics=("parallel",)),
        cost_estimate=cost,
    )(xT, fuzzifier, cT, neg_inv_col)

    return outT[:, :B].T                                    # back to (B, O)


def anfis_reference(x, fuzzifier, consequent, sigma):
    # Direct transcription of the PyTorch forward (pure JAX) for validation.
    xr = x[:, None, :]                                                # (B, 1, I)
    sq_dist = jnp.sum((xr - fuzzifier[None, :, :]) ** 2, axis=2)      # (B, R)
    fuzzy = jnp.exp(-sq_dist / sigma**2)                              # (B, R) / (O,)
    norm = fuzzy / jnp.sum(fuzzy, axis=1, keepdims=True)
    return jnp.sum(norm[:, :, None] * consequent[None, :, :], axis=1)


if __name__ == "__main__":
    # Shapes consistent with the module (I=4, R=O=8); batch large enough for a
    # 2-step grid of lane-dense 128-column tiles.
    # NOTE: the PyTorch broadcast (B, R) / (O,) requires num_outputs == num_rules.
    batch, num_inputs, num_rules, num_outputs = 256, 4, 8, 8

    key = jax.random.PRNGKey(0)
    kx, kf, kc, ks = jax.random.split(key, 4)
    x = jax.random.normal(kx, (batch, num_inputs), dtype=jnp.float32)
    fuzzifier = jax.random.normal(kf, (num_rules, num_inputs), dtype=jnp.float32)
    consequent = jax.random.normal(kc, (num_rules, num_outputs), dtype=jnp.float32)
    sigma = jax.random.normal(ks, (num_outputs,), dtype=jnp.float32)

    out = anfis_forward(x, fuzzifier, consequent, sigma)
    out = jax.block_until_ready(out)

    ref = anfis_reference(x, fuzzifier, consequent, sigma)
    assert out.shape == (batch, num_outputs)
    err = jnp.max(jnp.abs(out - ref))
    # Exact arithmetic everywhere (no MXU, no approx reciprocal): only f32
    # rounding / summation-order differences remain.
    assert jnp.allclose(out, ref, atol=1e-4, rtol=1e-4), f"max abs err {err}"

    print("KERNEL_OK")
</pallas_src>

<mosaic_0001>
module attributes {stable_mosaic.version = 11 : i64} {
  func.func @anfis_kernel(%arg0: i32, %arg1: memref<4x128xf32, #tpu.memory_space<vmem>>, %arg2: memref<8x4xf32, #tpu.memory_space<vmem>>, %arg3: memref<8x8xf32, #tpu.memory_space<vmem>>, %arg4: memref<8x1xf32, #tpu.memory_space<vmem>>, %arg5: memref<8x128xf32, #tpu.memory_space<vmem>>) attributes {dimension_semantics = [#tpu.dimension_semantics<parallel>], iteration_bounds = array<i64: 2>, scalar_prefetch = 0 : i64, scratch_operands = 0 : i64, tpu.core_type = #tpu.core_type<tc>, window_params = [{transform_indices = @transform_0, window_bounds = array<i64: 4, 128>}, {pipeline_mode = #tpu.pipeline_mode<synchronous>, transform_indices = @transform_1, window_bounds = array<i64: 8, 4>}, {pipeline_mode = #tpu.pipeline_mode<synchronous>, transform_indices = @transform_2, window_bounds = array<i64: 8, 8>}, {pipeline_mode = #tpu.pipeline_mode<synchronous>, transform_indices = @transform_3, window_bounds = array<i64: 8, 1>}, {transform_indices = @transform_4, window_bounds = array<i64: 8, 128>}]} {
    %c0 = arith.constant 0 : index
    %c0_0 = arith.constant 0 : index
    %0 = vector.load %arg1[%c0, %c0_0] : memref<4x128xf32, #tpu.memory_space<vmem>>, vector<4x128xf32>
    %c0_1 = arith.constant 0 : index
    %c0_2 = arith.constant 0 : index
    %1 = vector.load %arg2[%c0_1, %c0_2] : memref<8x4xf32, #tpu.memory_space<vmem>>, vector<8x4xf32>
    %c0_3 = arith.constant 0 : index
    %c0_4 = arith.constant 0 : index
    %2 = vector.load %arg3[%c0_3, %c0_4] : memref<8x8xf32, #tpu.memory_space<vmem>>, vector<8x8xf32>
    %c0_5 = arith.constant 0 : index
    %c0_6 = arith.constant 0 : index
    %3 = vector.load %arg4[%c0_5, %c0_6] : memref<8x1xf32, #tpu.memory_space<vmem>>, vector<8x1xf32>
    %cst = arith.constant 0.000000e+00 : f32
    %4 = vector.broadcast %cst : f32 to vector<8x128xf32>
    %5 = vector.extract_strided_slice %0 {offsets = [0, 0], sizes = [1, 128], strides = [1, 1]} : vector<4x128xf32> to vector<1x128xf32>
    %6 = vector.extract_strided_slice %1 {offsets = [0, 0], sizes = [8, 1], strides = [1, 1]} : vector<8x4xf32> to vector<8x1xf32>
    %7 = vector.broadcast %5 : vector<1x128xf32> to vector<8x128xf32>
    %8 = vector.broadcast %6 : vector<8x1xf32> to vector<8x128xf32>
    %9 = arith.subf %7, %8 : vector<8x128xf32>
    %10 = arith.mulf %9, %9 : vector<8x128xf32>
    %11 = arith.addf %4, %10 : vector<8x128xf32>
    %12 = vector.extract_strided_slice %0 {offsets = [1, 0], sizes = [1, 128], strides = [1, 1]} : vector<4x128xf32> to vector<1x128xf32>
    %13 = vector.extract_strided_slice %1 {offsets = [0, 1], sizes = [8, 1], strides = [1, 1]} : vector<8x4xf32> to vector<8x1xf32>
    %14 = vector.broadcast %12 : vector<1x128xf32> to vector<8x128xf32>
    %15 = vector.broadcast %13 : vector<8x1xf32> to vector<8x128xf32>
    %16 = arith.subf %14, %15 : vector<8x128xf32>
    %17 = arith.mulf %16, %16 : vector<8x128xf32>
    %18 = arith.addf %11, %17 : vector<8x128xf32>
    %19 = vector.extract_strided_slice %0 {offsets = [2, 0], sizes = [1, 128], strides = [1, 1]} : vector<4x128xf32> to vector<1x128xf32>
    %20 = vector.extract_strided_slice %1 {offsets = [0, 2], sizes = [8, 1], strides = [1, 1]} : vector<8x4xf32> to vector<8x1xf32>
    %21 = vector.broadcast %19 : vector<1x128xf32> to vector<8x128xf32>
    %22 = vector.broadcast %20 : vector<8x1xf32> to vector<8x128xf32>
    %23 = arith.subf %21, %22 : vector<8x128xf32>
    %24 = arith.mulf %23, %23 : vector<8x128xf32>
    %25 = arith.addf %18, %24 : vector<8x128xf32>
    %26 = vector.extract_strided_slice %0 {offsets = [3, 0], sizes = [1, 128], strides = [1, 1]} : vector<4x128xf32> to vector<1x128xf32>
    %27 = vector.extract_strided_slice %1 {offsets = [0, 3], sizes = [8, 1], strides = [1, 1]} : vector<8x4xf32> to vector<8x1xf32>
    %28 = vector.broadcast %26 : vector<1x128xf32> to vector<8x128xf32>
    %29 = vector.broadcast %27 : vector<8x1xf32> to vector<8x128xf32>
    %30 = arith.subf %28, %29 : vector<8x128xf32>
    %31 = arith.mulf %30, %30 : vector<8x128xf32>
    %32 = arith.addf %25, %31 : vector<8x128xf32>
    %33 = vector.broadcast %3 : vector<8x1xf32> to vector<8x128xf32>
    %34 = arith.mulf %32, %33 : vector<8x128xf32>
    %35 = math.exp %34 : vector<8x128xf32>
    %cst_7 = arith.constant dense<0.000000e+00> : vector<128xf32>
    %36 = vector.multi_reduction <add>, %35, %cst_7 [0] : vector<8x128xf32> to vector<128xf32>
    %37 = vector.shape_cast %36 : vector<128xf32> to vector<1x128xf32>
    %cst_8 = arith.constant 0.000000e+00 : f32
    %38 = vector.broadcast %cst_8 : f32 to vector<8x128xf32>
    %39 = vector.extract_strided_slice %2 {offsets = [0, 0], sizes = [8, 1], strides = [1, 1]} : vector<8x8xf32> to vector<8x1xf32>
    %40 = vector.extract_strided_slice %35 {offsets = [0, 0], sizes = [1, 128], strides = [1, 1]} : vector<8x128xf32> to vector<1x128xf32>
    %41 = vector.broadcast %39 : vector<8x1xf32> to vector<8x128xf32>
    %42 = vector.broadcast %40 : vector<1x128xf32> to vector<8x128xf32>
    %43 = arith.mulf %41, %42 : vector<8x128xf32>
    %44 = arith.addf %38, %43 : vector<8x128xf32>
    %45 = vector.extract_strided_slice %2 {offsets = [0, 1], sizes = [8, 1], strides = [1, 1]} : vector<8x8xf32> to vector<8x1xf32>
    %46 = vector.extract_strided_slice %35 {offsets = [1, 0], sizes = [1, 128], strides = [1, 1]} : vector<8x128xf32> to vector<1x128xf32>
    %47 = vector.broadcast %45 : vector<8x1xf32> to vector<8x128xf32>
    %48 = vector.broadcast %46 : vector<1x128xf32> to vector<8x128xf32>
    %49 = arith.mulf %47, %48 : vector<8x128xf32>
    %50 = arith.addf %44, %49 : vector<8x128xf32>
    %51 = vector.extract_strided_slice %2 {offsets = [0, 2], sizes = [8, 1], strides = [1, 1]} : vector<8x8xf32> to vector<8x1xf32>
    %52 = vector.extract_strided_slice %35 {offsets = [2, 0], sizes = [1, 128], strides = [1, 1]} : vector<8x128xf32> to vector<1x128xf32>
    %53 = vector.broadcast %51 : vector<8x1xf32> to vector<8x128xf32>
    %54 = vector.broadcast %52 : vector<1x128xf32> to vector<8x128xf32>
    %55 = arith.mulf %53, %54 : vector<8x128xf32>
    %56 = arith.addf %50, %55 : vector<8x128xf32>
    %57 = vector.extract_strided_slice %2 {offsets = [0, 3], sizes = [8, 1], strides = [1, 1]} : vector<8x8xf32> to vector<8x1xf32>
    %58 = vector.extract_strided_slice %35 {offsets = [3, 0], sizes = [1, 128], strides = [1, 1]} : vector<8x128xf32> to vector<1x128xf32>
    %59 = vector.broadcast %57 : vector<8x1xf32> to vector<8x128xf32>
    %60 = vector.broadcast %58 : vector<1x128xf32> to vector<8x128xf32>
    %61 = arith.mulf %59, %60 : vector<8x128xf32>
    %62 = arith.addf %56, %61 : vector<8x128xf32>
    %63 = vector.extract_strided_slice %2 {offsets = [0, 4], sizes = [8, 1], strides = [1, 1]} : vector<8x8xf32> to vector<8x1xf32>
    %64 = vector.extract_strided_slice %35 {offsets = [4, 0], sizes = [1, 128], strides = [1, 1]} : vector<8x128xf32> to vector<1x128xf32>
    %65 = vector.broadcast %63 : vector<8x1xf32> to vector<8x128xf32>
    %66 = vector.broadcast %64 : vector<1x128xf32> to vector<8x128xf32>
    %67 = arith.mulf %65, %66 : vector<8x128xf32>
    %68 = arith.addf %62, %67 : vector<8x128xf32>
    %69 = vector.extract_strided_slice %2 {offsets = [0, 5], sizes = [8, 1], strides = [1, 1]} : vector<8x8xf32> to vector<8x1xf32>
    %70 = vector.extract_strided_slice %35 {offsets = [5, 0], sizes = [1, 128], strides = [1, 1]} : vector<8x128xf32> to vector<1x128xf32>
    %71 = vector.broadcast %69 : vector<8x1xf32> to vector<8x128xf32>
    %72 = vector.broadcast %70 : vector<1x128xf32> to vector<8x128xf32>
    %73 = arith.mulf %71, %72 : vector<8x128xf32>
    %74 = arith.addf %68, %73 : vector<8x128xf32>
    %75 = vector.extract_strided_slice %2 {offsets = [0, 6], sizes = [8, 1], strides = [1, 1]} : vector<8x8xf32> to vector<8x1xf32>
    %76 = vector.extract_strided_slice %35 {offsets = [6, 0], sizes = [1, 128], strides = [1, 1]} : vector<8x128xf32> to vector<1x128xf32>
    %77 = vector.broadcast %75 : vector<8x1xf32> to vector<8x128xf32>
    %78 = vector.broadcast %76 : vector<1x128xf32> to vector<8x128xf32>
    %79 = arith.mulf %77, %78 : vector<8x128xf32>
    %80 = arith.addf %74, %79 : vector<8x128xf32>
    %81 = vector.extract_strided_slice %2 {offsets = [0, 7], sizes = [8, 1], strides = [1, 1]} : vector<8x8xf32> to vector<8x1xf32>
    %82 = vector.extract_strided_slice %35 {offsets = [7, 0], sizes = [1, 128], strides = [1, 1]} : vector<8x128xf32> to vector<1x128xf32>
    %83 = vector.broadcast %81 : vector<8x1xf32> to vector<8x128xf32>
    %84 = vector.broadcast %82 : vector<1x128xf32> to vector<8x128xf32>
    %85 = arith.mulf %83, %84 : vector<8x128xf32>
    %86 = arith.addf %80, %85 : vector<8x128xf32>
    %87 = tpu.reciprocal %37 : vector<1x128xf32> -> vector<1x128xf32>
    %88 = vector.broadcast %87 : vector<1x128xf32> to vector<8x128xf32>
    %89 = arith.mulf %86, %88 : vector<8x128xf32>
    %c0_9 = arith.constant 0 : index
    %c0_10 = arith.constant 0 : index
    %90 = vector.load %arg5[%c0_9, %c0_10] : memref<8x128xf32, #tpu.memory_space<vmem>>, vector<8x128xf32>
    tpu.vector_store %arg5[%c0_9, %c0_10], %89 {strides = array<i32>} : memref<8x128xf32, #tpu.memory_space<vmem>>, vector<8x128xf32>,
    return
  }
  func.func @transform_0(%arg0: i32) -> (i32, i32) {
    %c0_i32 = arith.constant 0 : i32
    %c0_i32_0 = arith.constant 0 : i32
    return %c0_i32, %arg0 : i32, i32
  }
  func.func @transform_1(%arg0: i32) -> (i32, i32) {
    %c0_i32 = arith.constant 0 : i32
    %c0_i32_0 = arith.constant 0 : i32
    %c0_i32_1 = arith.constant 0 : i32
    return %c0_i32, %c0_i32_0 : i32, i32
  }
  func.func @transform_2(%arg0: i32) -> (i32, i32) {
    %c0_i32 = arith.constant 0 : i32
    %c0_i32_0 = arith.constant 0 : i32
    %c0_i32_1 = arith.constant 0 : i32
    return %c0_i32, %c0_i32_0 : i32, i32
  }
  func.func @transform_3(%arg0: i32) -> (i32, i32) {
    %c0_i32 = arith.constant 0 : i32
    %c0_i32_0 = arith.constant 0 : i32
    %c0_i32_1 = arith.constant 0 : i32
    return %c0_i32, %c0_i32_0 : i32, i32
  }
  func.func @transform_4(%arg0: i32) -> (i32, i32) {
    %c0_i32 = arith.constant 0 : i32
    %c0_i32_0 = arith.constant 0 : i32
    return %c0_i32, %arg0 : i32, i32
  }
}

</mosaic_0001>

<bundles_post_ra>
// kernel: anfis_forward.1
= control target key start
LH: loop header
LB: loop body
LE: loop exit
PB: predicated region body
PF: predicated region fallthrough
CT: control target
= control target key end

     0   :  { %9 = vsyncpa [#allocation3], 0  ;;  %s661_s0 = inlined_call_operand.vmem [shape: f32[4,256], index: 0, kind: input, shape index: {}]   ;;  %s662_s1 = inlined_call_operand.vmem [shape: f32[8,4], index: 1, kind: input, shape index: {}]   ;;  %s663_s2 = inlined_call_operand.vmem [shape: f32[8,8], index: 2, kind: input, shape index: {}]   ;;  %s664_s3 = inlined_call_operand.vmem [shape: f32[8,1], index: 3, kind: input, shape index: {}]   ;;  %s665_s4 = inlined_call_operand.hbm [shape: f32[8,256], index: 4, kind: output, shape index: {}]  }
   0x1   :  { %11 = vsyncpa [#allocation3 + $0x1], 0  ;;  %s563_s15 = smov 0   ;;  %s565_s16 = smov 0  }
   0x2   :  { %s567_s17 = smov 0   ;;  %s569_s18 = smov 0  }
   0x3 LB: > { %s584_s19 = sadd.s32 4294967295, %s528_s18   ;;  %s392_s20 = sadd.s32 4294967294, %s528_s18   ;;  %s528_s18 = sphi %s569_s18, %s671_s18   ;;  %s524_s17 = sphi %s567_s17, %s670_s17   ;;  %s520_s16 = sphi %s565_s16, %s669_s16   ;;  %s516_s15 = sphi %s563_s15, %s668_s15  }
   0x4   : > { %s588_s21 = sadd.s32 1, %s528_s18   ;;  %s113_s22 = sadd.s32 1, %s524_s17 }
   0x5   : > { %s110_s23 = ssub.s32 %s528_s18, %s588_s21  ;;  %p123_p0 = scmp.ne.s32.totalorder %s524_s17, %s520_s16 }
   0x6   : > { %p111_p1 = scmp.eq.s32.totalorder %s110_s23, 0  ;;  %p124_p2 = scmp.eq.s32.totalorder %s584_s19, 1 }
   0x7   : > { %p129_p3 = scmp.ne.s32.totalorder %s520_s16, %s516_s15  ;;  %p130_p4 = scmp.eq.s32.totalorder %s392_s20, 1 }
   0x8   : > { %s599_s24 = scalar_select %p111_p1, %s524_s17, %s113_s22  }
   0x9   : > { %p601_p5 = por %p124_p2, %p123_p0  ;;  %p605_p6 = por %p130_p4, %p129_p3 }
   0xa   : > { %p395_p7 = scmp.ge.s32.totalorder %s528_s18, 1  ;;  %p164_p8 = scmp.lt.s32.totalorder %s528_s18, 3 }
   0xc   : > { %p165_p9 = pnand %p395_p7, %p164_p8 }
   0xd   : > { %p189_p10 = scmp.lt.s32.totalorder (!%p165_p9), %s584_s19, 1  ;;  %s186_s12 = sand.u32 (!%p165_p9), 1, %s520_s16  }
   0xe   : > { %168 = sbr.rel (%p165_p9) target bundleno = 200 (0xc8), region = 36  ;;  %s396_s13 = sshll.u32 (!%p165_p9), %s186_s12, 3 }
   0xf   : > { %s399_s14 = sshll.u32 (!%p165_p9), %s584_s19, 3  ;;  %s318_s29 = scalar_lea.sflag (!%p165_p9), [#allocation3], %s186_s12 }
  0x10   : > { %s328_s23 = scalar_lea.hbm (!%p165_p9), %s665_s4, %s399_s14 }
  0x11   : > { %s332_s28 = sshll.u32 (!%p165_p9), %s328_s23, 4  ;;  %s333_s28 = int_to_ptr.hbm [resolvable:$true] %s332_s28 }
  0x12   : > { %s480_s30 = sshra.s32 (!%p165_p9), %s333_s28, 4  ;;  %s481_s30 = int_to_ptr.hbm [resolvable:$true] %s480_s30 }
  0x13   : > { %v194_v0 = vld [vmem:[%s662_s1] sm:$0xff]  ;;  %v530_v1 = vmov 2   ;;  %v531_v2 = vmov 0   ;;  %v532_v4 = vmov 3   ;;  %v533_v5 = vmov 1   ;;  %s190_s7 = scalar_select %p189_p10, %s584_s19, 1 }
  0x14   : > { %451 = vset.pattern.permute.xlu1 %v530_v1  ;;  %449 = vset.pattern.permute.xlu0 %v531_v2  ;;  %v196_v3 = vld [vmem:[%s664_s3] sm:$0xff]  ;;  %v534_v7 = vmov 4   ;;  %v535_v8 = vmov 7   ;;  %v536_v9 = vmov 5   ;;  %v537_v10 = vmov 6   ;;  %s188_s19 = scalar_lea.vmem [#allocation2], %s396_s13  ;;  %p487_p0 = scmp.lt.s32.totalorder %s481_s30, %s665_s4 }
  0x15   : > { %216 = vperm.xlu1 %451, %v194_v0   ;;  %200 = vperm.xlu0 %449, %v194_v0   ;;  %v195_v6 = vld [vmem:[%s663_s2] sm:$0xff]  ;;  %s397_s8 = sshll.u32 %s190_s7, 2  ;;  %s330_s27 = sshll.u32 %s188_s19, 4  ;;  %s331_s27 = int_to_ptr.vmem [resolvable:$true] %s330_s27 }
  0x16   : > { %453 = vset.pattern.permute.xlu2 %v531_v2  ;;  %s192_s11 = scalar_lea.vmem %s661_s0, %s397_s8  ;;  %s482_s5 = scalar_lea.hbm %s481_s30, 8 }
  0x17   : > { %232 = vperm.xlu2 %453, %v196_v3   ;;  %v193_v13 = vld [vmem:[%s192_s11] sm:$0xf]  ;;  %p483_p11 = scmp.ne.s32.totalorder %s481_s30, %s482_s5  ;;  %s486_s8 = scalar_lea.hbm %s665_s4, 16 }
  0x18   : > { %v197_v14 = vperm.slane %v193_v13, 0  ;;  %v214_v15 = vperm.slane %v193_v13, 2  ;;  %v206_v16 = vperm.slane %v193_v13, 1  ;;  %v222_v17 = vperm.slane %v193_v13, 3  ;;  %p488_p1 = scmp.lt.s32.totalorder %s486_s8, %s482_s5 }
  0x19   : > { %p484_p12 = pnand %p483_p11, %p601_p5 }
  0x1a   : > { %p489_p2 = por %p488_p1, %p487_p0 }
  0x1b   : > { %p485_p13 = pneg %p484_p12 }
  0x1d   : > { %452 = vset.pattern.permute.xlu1 %v532_v4  ;;  %450 = vset.pattern.permute.xlu0 %v533_v5  ;;  %p490_p3 = pnand %p489_p2, %p485_p13 }
  0x1e   : > { %224 = vperm.xlu1 %452, %v194_v0   ;;  %208 = vperm.xlu0 %450, %v194_v0  }
  0x1f   : > { %246 = vperm.xlu2 %453, %v195_v6  }
  0x26   : > { %454 = vset.pattern.permute.xlu1 %v533_v5  ;;  %456 = vset.pattern.permute.xlu0 %v532_v4 }
  0x27   : > { %253 = vperm.xlu1 %454, %v195_v6   ;;  %267 = vperm.xlu0 %456, %v195_v6  }
  0x28   : > { %455 = vset.pattern.permute.xlu2 %v530_v1 }
  0x29   : > { %260 = vperm.xlu2 %455, %v195_v6  }
  0x2f   : > { %457 = vset.pattern.permute.xlu1 %v534_v7  ;;  %461 = vset.pattern.permute.xlu0 %v535_v8 }
  0x30   : > { %274 = vperm.xlu1 %457, %v195_v6  }
  0x31   : > { %458 = vset.pattern.permute.xlu2 %v536_v9 }
  0x32   : > { %281 = vperm.xlu2 %458, %v195_v6  }
  0x38   : > { %459 = vset.pattern.permute.xlu1 %v537_v10 }
  0x39   : > { %288 = vperm.xlu1 %459, %v195_v6  }
  0x3a   : > { %460 = vset.pattern.permute.xlu2 %v535_v8 }
  0x3b   : > { %295 = vperm.xlu2 %460, %v195_v6  }
  0x71   : > { %v233_v29 = vpop.permute.xlu2 %232 }
  0x79   : > { %v247_v34 = vpop.permute.xlu2 %246 }
  0x83   : > { %v261_v43 = vpop.permute.xlu2 %260 }
  0x87   : > { %v201_v11 = vpop.permute.xlu0 %200  ;;  %v217_v12 = vpop.permute.xlu1 %216 }
  0x88   : > { %v203_v18 = vsub.f32 %v197_v14, %v201_v11  ;;  %v219_v21 = vsub.f32 %v214_v15, %v217_v12 }
  0x8a   : > { %v204_v24 = vmul.f32 %v203_v18, %v203_v18  ;;  %v220_v26 = vmul.f32 %v219_v21, %v219_v21 }
  0x8c   : > { %v282_v58 = vpop.permute.xlu2 %281 }
  0x90   : > { %v209_v19 = vpop.permute.xlu0 %208  ;;  %v225_v20 = vpop.permute.xlu1 %224 }
  0x91   : > { %v211_v22 = vsub.f32 %v206_v16, %v209_v19  ;;  %v227_v23 = vsub.f32 %v222_v17, %v225_v20 }
  0x93   : > { %v212_v25 = vmul.f32 %v211_v22, %v211_v22  ;;  %v228_v28 = vmul.f32 %v227_v23, %v227_v23 }
  0x95   : > { %v213_v27 = vadd.f32 %v212_v25, %v204_v24  ;;  %v296_v7 = vpop.permute.xlu2 %295 }
  0x97   : > { %v221_v30 = vadd.f32 %v220_v26, %v213_v27 }
  0x99   : > { %v229_v31 = vadd.f32 %v228_v28, %v221_v30  ;;  %v254_v38 = vpop.permute.xlu1 %253  ;;  %v268_v49 = vpop.permute.xlu0 %267 }
  0x9b   : > { %v235_v32 = vmul.f32 %v233_v29, %v229_v31 }
  0x9d   : > { %v236_v33 = vmul.f32 1.442695, %v235_v32 }
  0x9f   : > { %462 = vpow2.f32 %v236_v33 }
  0xa2   : > { %v275_v52 = vpop.permute.xlu1 %274 }
  0xa5   : > { %v463_v35 = vpop.eup %462 }
  0xa6   : > { %v249_v36 = vperm.slane %v463_v35, 0  ;;  %v256_v37 = vperm.slane %v463_v35, 1  ;;  %v238_v41 = vrot.slane %v463_v35, 4  ;;  %v263_v42 = vperm.slane %v463_v35, 2 }
  0xa7   : > { %v270_v48 = vperm.slane %v463_v35, 3  ;;  %v277_v54 = vperm.slane %v463_v35, 4  ;;  %v284_v59 = vperm.slane %v463_v35, 5  ;;  %v291_v2 = vperm.slane %v463_v35, 6 }
  0xa8   : > { %v250_v39 = vmul.f32 %v249_v36, %v247_v34  ;;  %v257_v40 = vmul.f32 %v256_v37, %v254_v38  ;;  %v239_v44 = vadd.f32 %v463_v35, %v238_v41  ;;  %v264_v47 = vmul.f32 %v263_v42, %v261_v43 }
  0xa9   : > { %v271_v55 = vmul.f32 %v270_v48, %v268_v49  ;;  %v278_v60 = vmul.f32 %v277_v54, %v275_v52  ;;  %v285_v62 = vmul.f32 %v284_v59, %v282_v58  ;;  %v298_v4 = vperm.slane %v463_v35, 7 }
  0xaa   : > { %v258_v45 = vadd.f32 %v257_v40, %v250_v39  ;;  %v240_v46 = vrot.slane %v239_v44, 2 }
  0xab   : > { %v289_v0 = vpop.permute.xlu1 %288  ;;  %v299_v12 = vmul.f32 %v298_v4, %v296_v7 }
  0xac   : > { %v241_v50 = vadd.f32 %v240_v46, %v239_v44  ;;  %v265_v51 = vadd.f32 %v264_v47, %v258_v45  ;;  %v292_v5 = vmul.f32 %v291_v2, %v289_v0 }
  0xae   : > { %v242_v53 = vrot.slane %v241_v50, 1  ;;  %v272_v57 = vadd.f32 %v271_v55, %v265_v51 }
  0xb0   : > { %v243_v56 = vadd.f32 %v242_v53, %v241_v50  ;;  %v279_v61 = vadd.f32 %v278_v60, %v272_v57 }
  0xb2   : > { %464 = vrcp.f32 %v243_v56  ;;  %v286_v1 = vadd.f32 %v285_v62, %v279_v61  ;;  %v312_v8 = vand.u32 2147483648, %v243_v56  ;;  %v310_v11 = vand.u32 2147483647, %v243_v56 }
  0xb3   : > { %vm306_vm1 = vweird.f32 %v243_v56 }
  0xb4   : > { %v293_v9 = vadd.f32 %v292_v5, %v286_v1  ;;  %v313_v14 = vor.u32 1.1754944e-38, %v312_v8  ;;  %vm311_vm3 = vcmp.eq.f32.partialorder %v310_v11, 8.507059e+37 }
  0xb6   : > { %v300_v15 = vadd.f32 %v299_v12, %v293_v9 }
  0xb8   : > { %v465_v63 = vpop.eup %464 }
  0xb9   : > { %v302_v3 = vmul.f32 %v465_v63, %v243_v56  ;;  %vm307_vm0 = vweird.f32 %v465_v63 }
  0xba   : > { %vm308_vm2 = vmor %vm306_vm1, %vm307_vm0 }
  0xbb   : > { %v303_v6 = vsub.f32 1.0, %v302_v3 }
  0xbd   : > { %v304_v10 = vmul.f32 %v465_v63, %v303_v6 }
  0xbf   : > { %v305_v13 = vadd.f32 %v465_v63, %v304_v10 }
  0xc1   : > { %v309_v16 = vsel %vm308_vm2, %v465_v63, %v305_v13 }
  0xc2   : > { %v314_v17 = vsel %vm311_vm3, %v313_v14, %v309_v16 }
  0xc3   : > { %v315_v18 = vmul.f32 %v314_v17, %v300_v15 }
  0xc5   : > { %316 = vst [vmem:[%s188_s19] sm:$0xff] %v315_v18 }
  0xc6   : > { %493 = shalt.err (!%p490_p3)
}
  0xc7   : > { %402 = dma.vmem_to_hbm [thread:$0]  (%p601_p5), %s331_s27, 128, %s333_s28, %s318_s29  }
  0xc8 PF: > { %p408_p4 = scmp.ge.s32.totalorder %s528_s18, 2  ;;  %s344_s11 = sand.u32 1, %s516_s15  }
  0xc9   : > { %s345_s12 = scalar_lea.sflag [#allocation3], %s344_s11 }
  0xca   : > { %p405_p7 = pnand %p408_p4, %p605_p6 }
  0xcc   : > { %p406_p8 = pneg %p405_p7 }
  0xce   : > { %511 = dma.done.wait (%p406_p8), %s345_s12, 128  }
  0xcf   : > { %513 = vsyncadd (%p406_p8), %s345_s12, 4294967168  ;;  %p14_p9 = scmp.ge.s32.totalorder %s588_s21, 4   ;;  %s668_s15 = smov %s520_s16 }
  0xd0   : > { %s669_s16 = smov %s524_s17  ;;  %s670_s17 = smov %s599_s24 }
  0xd1   : > { %s671_s18 = smov %s588_s21  ;;  %16 = sbr.rel (!%p14_p9) target bundleno = 3 (0x3), region = 71 }
  0xd6   :  { %351 = vsyncpa [#allocation3], 1 }
  0xd7   :  { %353 = vsyncpa [#allocation3 + $0x1], 1 }

</bundles_post_ra>
